<compile_context>
chip_gen: v5e
topology: v5e:2x2
jax: 0.10.0
libtpu: 0.0.40
codegen_flags: <defaults>
</compile_context>

<pallas_src>
import functools

import jax
import jax.numpy as jnp
import numpy as np
from jax.experimental import pallas as pl
from jax.experimental.pallas import tpu as pltpu

EPS = 1e-5


def _basic_block_kernel(x_ref, wb1_ref, g1_ref, b1_ref,
                        wb2_ref, g2_ref, b2_ref, sel_ref, selt_ref, out_ref,
                        *, H):
    # x_ref    : (M, WC)      f32  input, rows = (n, y), lanes = x*C + c
    # wb*_ref  : (3, WC, WC)  bf16 banded (Toeplitz-in-x) conv weights per ky tap
    # g*/b*    : (1, C)       f32  BN gamma / beta
    # sel_ref  : (WC, C)      f32  lane -> channel one-hot reduction matrix
    # selt_ref : (C, WC)      f32  channel -> lane broadcast matrix
    # out_ref  : (M, WC)      f32
    M, WC = x_ref.shape
    C = sel_ref.shape[1]
    inv_count = 1.0 / float(M * (WC // C))              # 1 / (N*H*W)

    x = x_ref[...]                                       # shortcut + conv1 input
    sel = sel_ref[...]
    selt = selt_ref[...]

    # y-index of each row within its image; used to zero the rolled rows that
    # would otherwise leak across image boundaries (the conv's y zero-padding).
    y_idx = jax.lax.broadcasted_iota(jnp.int32, (M, WC), 0) % H
    top_row = y_idx == 0
    bot_row = y_idx == (H - 1)

    def conv3x3(src_f32, wb_ref):
        # src_f32: (M, WC) f32 -> conv output (M, WC) f32.
        # y taps: sublane rolls (XLU) + boundary mask (VPU); x taps: folded into
        # the banded weights and handled by the MXU contraction.
        down = jnp.where(top_row, 0.0, pltpu.roll(src_f32, shift=1, axis=0))
        up = jnp.where(bot_row, 0.0, pltpu.roll(src_f32, shift=M - 1, axis=0))
        acc = jnp.dot(down.astype(jnp.bfloat16), wb_ref[0],
                      preferred_element_type=jnp.float32)
        acc = acc + jnp.dot(src_f32.astype(jnp.bfloat16), wb_ref[1],
                            preferred_element_type=jnp.float32)
        acc = acc + jnp.dot(up.astype(jnp.bfloat16), wb_ref[2],
                            preferred_element_type=jnp.float32)
        return acc

    def bn_scale_bias(t, gamma, beta):
        # t: (M, WC) f32.  Single-pass per-channel batch stats (biased var),
        # folded into a lane-wide scale/bias so the normalize is one FMA.
        sum_lane = jnp.sum(t, axis=0, keepdims=True)                      # (1,WC)
        ssq_lane = jnp.sum(t * t, axis=0, keepdims=True)                  # (1,WC)
        mean_c = jnp.dot(sum_lane, sel,
                         preferred_element_type=jnp.float32) * inv_count  # (1,C)
        msq_c = jnp.dot(ssq_lane, sel,
                        preferred_element_type=jnp.float32) * inv_count   # (1,C)
        var_c = jnp.maximum(msq_c - mean_c * mean_c, 0.0)                 # (1,C)
        scale_c = gamma * jax.lax.rsqrt(var_c + EPS)                      # (1,C)
        bias_c = beta - mean_c * scale_c                                  # (1,C)
        scale_lane = jnp.dot(scale_c, selt, preferred_element_type=jnp.float32)
        bias_lane = jnp.dot(bias_c, selt, preferred_element_type=jnp.float32)
        return scale_lane, bias_lane

    # conv1 -> bn1 -> relu  (BN folded to one FMA, ReLU fused)
    c1 = conv3x3(x, wb1_ref)
    sc1, bi1 = bn_scale_bias(c1, g1_ref[...], b1_ref[...])
    out1 = jnp.maximum(c1 * sc1 + bi1, 0.0)

    # conv2 -> bn2
    c2 = conv3x3(out1, wb2_ref)
    sc2, bi2 = bn_scale_bias(c2, g2_ref[...], b2_ref[...])

    # bn2 + identity shortcut, final relu  (lane-dense unmasked store)
    out_ref[...] = jnp.maximum(c2 * sc2 + bi2 + x, 0.0)


def basic_block(x_nchw, w1_oihw, g1, b1, w2_oihw, g2, b2):
    """x_nchw: [N, C, H, W] float32. PyTorch-layout conv weights (Cout,Cin,3,3),
    BN gamma/beta (C,). Returns [N, C, H, W]."""
    N, C, H, W = x_nchw.shape
    M, WC = N * H, W * C

    # NCHW -> NHWC -> (N*H, W*C): rows = (n, y), lanes = x*C + c (layout plumbing).
    x2d = jnp.transpose(x_nchw, (0, 2, 3, 1)).reshape(M, WC)

    def banded(w_oihw):
        # (Cout,Cin,ky,kx) -> per-ky banded matrix B[ky] of shape (W*C, W*C):
        #   B[ky][(x+kx-1)*C + ci, x*C + co] = w[ky, kx, ci, co]  (zero outside)
        w = jnp.transpose(w_oihw, (2, 3, 1, 0))                 # (ky, kx, Cin, Cout)
        bands = []
        for dy in range(3):
            band = jnp.zeros((WC, WC), jnp.float32)
            for dx in range(3):
                band = band + jnp.kron(jnp.eye(W, k=1 - dx, dtype=jnp.float32),
                                       w[dy, dx])
            bands.append(band)
        return jnp.stack(bands).astype(jnp.bfloat16)            # (3, WC, WC)

    wb1 = banded(w1_oihw)
    wb2 = banded(w2_oihw)

    # Lane <-> channel one-hot maps (for per-channel BN stats in the x*C+c layout).
    sel = jnp.kron(jnp.ones((W, 1), jnp.float32),
                   jnp.eye(C, dtype=jnp.float32))               # (WC, C)
    selt = sel.T                                                # (C, WC)

    vmem = pl.BlockSpec(memory_space=pltpu.MemorySpace.VMEM)

    # 6 conv GEMMs + 8 tiny BN selector GEMMs + elementwise (rolls/masks/FMAs).
    flops = (2 * 3 * 2 * M * WC * WC          # conv GEMMs (both convs)
             + 8 * 2 * WC * C                 # BN selector matmuls
             + 40 * M * WC)                   # elementwise / reductions
    bytes_accessed = (2 * 4 * M * WC          # x in + out
                      + 2 * 2 * 3 * WC * WC   # two banded weights (bf16)
                      + 2 * 4 * WC * C        # sel / selt
                      + 4 * 4 * C)            # gamma / beta
    cost = pl.CostEstimate(flops=int(flops), transcendentals=int(2 * C),
                           bytes_accessed=int(bytes_accessed))

    kernel = functools.partial(_basic_block_kernel, H=H)

    out2d = pl.pallas_call(
        kernel,
        out_shape=jax.ShapeDtypeStruct((M, WC), jnp.float32),
        in_specs=[vmem] * 9,
        out_specs=vmem,
        cost_estimate=cost,
        compiler_params=pltpu.CompilerParams(vmem_limit_bytes=32 * 1024 * 1024),
    )(x2d, wb1, g1.reshape(1, C), b1.reshape(1, C),
      wb2, g2.reshape(1, C), b2.reshape(1, C), sel, selt)

    return jnp.transpose(out2d.reshape(N, H, W, C), (0, 3, 1, 2))   # back to NCHW


# ---------------- reference (plain JAX, NCHW like PyTorch) ----------------
def _conv3x3_ref(x, w_oihw):
    return jax.lax.conv_general_dilated(
        x, w_oihw, window_strides=(1, 1), padding=((1, 1), (1, 1)),
        dimension_numbers=('NCHW', 'OIHW', 'NCHW'))


def _bn_ref(x, gamma, beta):
    mean = x.mean(axis=(0, 2, 3), keepdims=True)
    var = ((x - mean) ** 2).mean(axis=(0, 2, 3), keepdims=True)
    g = gamma.reshape(1, -1, 1, 1)
    b = beta.reshape(1, -1, 1, 1)
    return (x - mean) * (g / jnp.sqrt(var + EPS)) + b


def basic_block_ref(x, w1_oihw, g1, b1, w2_oihw, g2, b2):
    out = jax.nn.relu(_bn_ref(_conv3x3_ref(x, w1_oihw), g1, b1))
    out = _bn_ref(_conv3x3_ref(out, w2_oihw), g2, b2)
    return jax.nn.relu(out + x)


if __name__ == "__main__":
    N, C, H, W = 2, 8, 16, 16          # in_planes = planes = 8, stride = 1
    key = jax.random.PRNGKey(0)
    kx, k1, k2, kg1, kb1, kg2, kb2 = jax.random.split(key, 7)

    x = jax.random.normal(kx, (N, C, H, W), jnp.float32)

    # PyTorch conv weight layout: (Cout, Cin, kH, kW)
    w1_oihw = 0.1 * jax.random.normal(k1, (C, C, 3, 3), jnp.float32)
    w2_oihw = 0.1 * jax.random.normal(k2, (C, C, 3, 3), jnp.float32)
    g1 = 1.0 + 0.1 * jax.random.normal(kg1, (C,), jnp.float32)
    b1 = 0.1 * jax.random.normal(kb1, (C,), jnp.float32)
    g2 = 1.0 + 0.1 * jax.random.normal(kg2, (C,), jnp.float32)
    b2 = 0.1 * jax.random.normal(kb2, (C,), jnp.float32)

    out = jax.block_until_ready(basic_block(x, w1_oihw, g1, b1, w2_oihw, g2, b2))
    ref = jax.block_until_ready(basic_block_ref(x, w1_oihw, g1, b1, w2_oihw, g2, b2))

    np.testing.assert_allclose(np.asarray(out), np.asarray(ref),
                               rtol=5e-2, atol=5e-2)
    print("KERNEL_OK")
</pallas_src>

<mosaic_0001>
module attributes {stable_mosaic.version = 11 : i64} {
  func.func @_basic_block_kernel(%arg0: memref<32x128xf32, #tpu.memory_space<vmem>>, %arg1: memref<3x128x128xbf16, #tpu.memory_space<vmem>>, %arg2: memref<1x8xf32, #tpu.memory_space<vmem>>, %arg3: memref<1x8xf32, #tpu.memory_space<vmem>>, %arg4: memref<3x128x128xbf16, #tpu.memory_space<vmem>>, %arg5: memref<1x8xf32, #tpu.memory_space<vmem>>, %arg6: memref<1x8xf32, #tpu.memory_space<vmem>>, %arg7: memref<128x8xf32, #tpu.memory_space<vmem>>, %arg8: memref<8x128xf32, #tpu.memory_space<vmem>>, %arg9: memref<32x128xf32, #tpu.memory_space<vmem>>) attributes {dimension_semantics = [], scalar_prefetch = 0 : i64, scratch_operands = 0 : i64, tpu.core_type = #tpu.core_type<tc>} {
    %c0 = arith.constant 0 : index
    %c0_0 = arith.constant 0 : index
    %0 = vector.load %arg0[%c0, %c0_0] : memref<32x128xf32, #tpu.memory_space<vmem>>, vector<32x128xf32>
    %c0_1 = arith.constant 0 : index
    %c0_2 = arith.constant 0 : index
    %1 = vector.load %arg7[%c0_1, %c0_2] : memref<128x8xf32, #tpu.memory_space<vmem>>, vector<128x8xf32>
    %c0_3 = arith.constant 0 : index
    %c0_4 = arith.constant 0 : index
    %2 = vector.load %arg8[%c0_3, %c0_4] : memref<8x128xf32, #tpu.memory_space<vmem>>, vector<8x128xf32>
    %3 = tpu.iota {dimensions = array<i32: 0>} : vector<32x128xi32>
    %c16_i32 = arith.constant 16 : i32
    %c0_i32 = arith.constant 0 : i32
    %4 = arith.cmpi eq, %c16_i32, %c0_i32 : i32
    %c1_i32 = arith.constant 1 : i32
    %5 = arith.select %4, %c1_i32, %c16_i32 : i32
    %6 = vector.broadcast %5 : i32 to vector<32x128xi32>
    %7 = arith.remsi %3, %6 : vector<32x128xi32>
    %c0_i32_5 = arith.constant 0 : i32
    %8 = vector.broadcast %c0_i32_5 : i32 to vector<32x128xi32>
    %9 = arith.cmpi ne, %7, %8 : vector<32x128xi32>
    %c0_i32_6 = arith.constant 0 : i32
    %10 = vector.broadcast %c0_i32_6 : i32 to vector<32x128xi32>
    %11 = arith.cmpi slt, %7, %10 : vector<32x128xi32>
    %c0_i32_7 = arith.constant 0 : i32
    %12 = arith.cmpi slt, %5, %c0_i32_7 : i32
    %13 = vector.broadcast %12 : i1 to vector<32x128xi1>
    %14 = vector.broadcast %13 : vector<32x128xi1> to vector<32x128xi1>
    %15 = arith.xori %11, %14 : vector<32x128xi1>
    %16 = arith.andi %15, %9 : vector<32x128xi1>
    %17 = vector.broadcast %5 : i32 to vector<32x128xi32>
    %18 = arith.addi %7, %17 : vector<32x128xi32>
    %19 = arith.select %16, %18, %7 : vector<32x128xi1>, vector<32x128xi32>
    %c0_i32_8 = arith.constant 0 : i32
    %20 = vector.broadcast %c0_i32_8 : i32 to vector<32x128xi32>
    %21 = arith.cmpi eq, %19, %20 : vector<32x128xi32>
    %c15_i32 = arith.constant 15 : i32
    %22 = vector.broadcast %c15_i32 : i32 to vector<32x128xi32>
    %23 = arith.cmpi eq, %19, %22 : vector<32x128xi32>
    %c1_i32_9 = arith.constant 1 : i32
    %24 = tpu.dynamic_rotate %0 by %c1_i32_9 dim 0 : vector<32x128xf32>, i32 -> vector<32x128xf32>
    %cst = arith.constant 0.000000e+00 : f32
    %25 = vector.broadcast %cst : f32 to vector<32x128xf32>
    %26 = arith.select %21, %25, %24 : vector<32x128xi1>, vector<32x128xf32>
    %c31_i32 = arith.constant 31 : i32
    %27 = tpu.dynamic_rotate %0 by %c31_i32 dim 0 : vector<32x128xf32>, i32 -> vector<32x128xf32>
    %cst_10 = arith.constant 0.000000e+00 : f32
    %28 = vector.broadcast %cst_10 : f32 to vector<32x128xf32>
    %29 = arith.select %23, %28, %27 : vector<32x128xi1>, vector<32x128xf32>
    %30 = arith.truncf %26 : vector<32x128xf32> to vector<32x128xbf16>
    %c0_11 = arith.constant 0 : index
    %c0_12 = arith.constant 0 : index
    %c0_13 = arith.constant 0 : index
    %31 = vector.load %arg1[%c0_11, %c0_12, %c0_13] : memref<3x128x128xbf16, #tpu.memory_space<vmem>>, vector<1x128x128xbf16>
    %32 = vector.shape_cast %31 : vector<1x128x128xbf16> to vector<128x128xbf16>
    %cst_14 = arith.constant dense<0.000000e+00> : vector<32x128xf32>
    %33 = tpu.matmul %30, %32, %cst_14 {dimension_numbers = #tpu.dot_dimension_numbers<[1], [0], [0], [1], [0, 0, 1, 1], [], []>} : vector<32x128xbf16>, vector<128x128xbf16>, vector<32x128xf32> -> vector<32x128xf32>
    %34 = arith.truncf %0 : vector<32x128xf32> to vector<32x128xbf16>
    %c1 = arith.constant 1 : index
    %c0_15 = arith.constant 0 : index
    %c0_16 = arith.constant 0 : index
    %35 = vector.load %arg1[%c1, %c0_15, %c0_16] : memref<3x128x128xbf16, #tpu.memory_space<vmem>>, vector<1x128x128xbf16>
    %36 = vector.shape_cast %35 : vector<1x128x128xbf16> to vector<128x128xbf16>
    %cst_17 = arith.constant dense<0.000000e+00> : vector<32x128xf32>
    %37 = tpu.matmul %34, %36, %cst_17 {dimension_numbers = #tpu.dot_dimension_numbers<[1], [0], [0], [1], [0, 0, 1, 1], [], []>} : vector<32x128xbf16>, vector<128x128xbf16>, vector<32x128xf32> -> vector<32x128xf32>
    %38 = arith.addf %33, %37 : vector<32x128xf32>
    %39 = arith.truncf %29 : vector<32x128xf32> to vector<32x128xbf16>
    %c2 = arith.constant 2 : index
    %c0_18 = arith.constant 0 : index
    %c0_19 = arith.constant 0 : index
    %40 = vector.load %arg1[%c2, %c0_18, %c0_19] : memref<3x128x128xbf16, #tpu.memory_space<vmem>>, vector<1x128x128xbf16>
    %41 = vector.shape_cast %40 : vector<1x128x128xbf16> to vector<128x128xbf16>
    %cst_20 = arith.constant dense<0.000000e+00> : vector<32x128xf32>
    %42 = tpu.matmul %39, %41, %cst_20 {dimension_numbers = #tpu.dot_dimension_numbers<[1], [0], [0], [1], [0, 0, 1, 1], [], []>} : vector<32x128xbf16>, vector<128x128xbf16>, vector<32x128xf32> -> vector<32x128xf32>
    %43 = arith.addf %38, %42 : vector<32x128xf32>
    %c0_21 = arith.constant 0 : index
    %c0_22 = arith.constant 0 : index
    %44 = vector.load %arg2[%c0_21, %c0_22] : memref<1x8xf32, #tpu.memory_space<vmem>>, vector<1x8xf32>
    %c0_23 = arith.constant 0 : index
    %c0_24 = arith.constant 0 : index
    %45 = vector.load %arg3[%c0_23, %c0_24] : memref<1x8xf32, #tpu.memory_space<vmem>>, vector<1x8xf32>
    %cst_25 = arith.constant dense<0.000000e+00> : vector<128xf32>
    %46 = vector.multi_reduction <add>, %43, %cst_25 [0] : vector<32x128xf32> to vector<128xf32>
    %47 = vector.shape_cast %46 : vector<128xf32> to vector<1x128xf32>
    %48 = arith.mulf %43, %43 : vector<32x128xf32>
    %cst_26 = arith.constant dense<0.000000e+00> : vector<128xf32>
    %49 = vector.multi_reduction <add>, %48, %cst_26 [0] : vector<32x128xf32> to vector<128xf32>
    %50 = vector.shape_cast %49 : vector<128xf32> to vector<1x128xf32>
    %cst_27 = arith.constant dense<0.000000e+00> : vector<1x8xf32>
    %51 = tpu.matmul %47, %1, %cst_27 {dimension_numbers = #tpu.dot_dimension_numbers<[1], [0], [0], [1], [0, 0, 1, 1], [], []>} : vector<1x128xf32>, vector<128x8xf32>, vector<1x8xf32> -> vector<1x8xf32>
    %cst_28 = arith.constant 0.001953125 : f32
    %52 = vector.broadcast %cst_28 : f32 to vector<1x8xf32>
    %53 = arith.mulf %51, %52 : vector<1x8xf32>
    %cst_29 = arith.constant dense<0.000000e+00> : vector<1x8xf32>
    %54 = tpu.matmul %50, %1, %cst_29 {dimension_numbers = #tpu.dot_dimension_numbers<[1], [0], [0], [1], [0, 0, 1, 1], [], []>} : vector<1x128xf32>, vector<128x8xf32>, vector<1x8xf32> -> vector<1x8xf32>
    %cst_30 = arith.constant 0.001953125 : f32
    %55 = vector.broadcast %cst_30 : f32 to vector<1x8xf32>
    %56 = arith.mulf %54, %55 : vector<1x8xf32>
    %57 = arith.mulf %53, %53 : vector<1x8xf32>
    %58 = arith.subf %56, %57 : vector<1x8xf32>
    %cst_31 = arith.constant 0.000000e+00 : f32
    %59 = vector.broadcast %cst_31 : f32 to vector<1x8xf32>
    %60 = arith.maximumf %58, %59 : vector<1x8xf32>
    %cst_32 = arith.constant 9.99999974E-6 : f32
    %61 = vector.broadcast %cst_32 : f32 to vector<1x8xf32>
    %62 = arith.addf %60, %61 : vector<1x8xf32>
    %63 = math.rsqrt %62 : vector<1x8xf32>
    %64 = arith.mulf %44, %63 : vector<1x8xf32>
    %65 = arith.mulf %53, %64 : vector<1x8xf32>
    %66 = arith.subf %45, %65 : vector<1x8xf32>
    %cst_33 = arith.constant dense<0.000000e+00> : vector<1x128xf32>
    %67 = tpu.matmul %64, %2, %cst_33 {dimension_numbers = #tpu.dot_dimension_numbers<[1], [0], [0], [1], [0, 0, 1, 1], [], []>} : vector<1x8xf32>, vector<8x128xf32>, vector<1x128xf32> -> vector<1x128xf32>
    %cst_34 = arith.constant dense<0.000000e+00> : vector<1x128xf32>
    %68 = tpu.matmul %66, %2, %cst_34 {dimension_numbers = #tpu.dot_dimension_numbers<[1], [0], [0], [1], [0, 0, 1, 1], [], []>} : vector<1x8xf32>, vector<8x128xf32>, vector<1x128xf32> -> vector<1x128xf32>
    %69 = vector.broadcast %67 : vector<1x128xf32> to vector<32x128xf32>
    %70 = arith.mulf %43, %69 : vector<32x128xf32>
    %71 = vector.broadcast %68 : vector<1x128xf32> to vector<32x128xf32>
    %72 = arith.addf %70, %71 : vector<32x128xf32>
    %cst_35 = arith.constant 0.000000e+00 : f32
    %73 = vector.broadcast %cst_35 : f32 to vector<32x128xf32>
    %74 = arith.maximumf %72, %73 : vector<32x128xf32>
    %c1_i32_36 = arith.constant 1 : i32
    %75 = tpu.dynamic_rotate %74 by %c1_i32_36 dim 0 : vector<32x128xf32>, i32 -> vector<32x128xf32>
    %cst_37 = arith.constant 0.000000e+00 : f32
    %76 = vector.broadcast %cst_37 : f32 to vector<32x128xf32>
    %77 = arith.select %21, %76, %75 : vector<32x128xi1>, vector<32x128xf32>
    %c31_i32_38 = arith.constant 31 : i32
    %78 = tpu.dynamic_rotate %74 by %c31_i32_38 dim 0 : vector<32x128xf32>, i32 -> vector<32x128xf32>
    %cst_39 = arith.constant 0.000000e+00 : f32
    %79 = vector.broadcast %cst_39 : f32 to vector<32x128xf32>
    %80 = arith.select %23, %79, %78 : vector<32x128xi1>, vector<32x128xf32>
    %81 = arith.truncf %77 : vector<32x128xf32> to vector<32x128xbf16>
    %c0_40 = arith.constant 0 : index
    %c0_41 = arith.constant 0 : index
    %c0_42 = arith.constant 0 : index
    %82 = vector.load %arg4[%c0_40, %c0_41, %c0_42] : memref<3x128x128xbf16, #tpu.memory_space<vmem>>, vector<1x128x128xbf16>
    %83 = vector.shape_cast %82 : vector<1x128x128xbf16> to vector<128x128xbf16>
    %cst_43 = arith.constant dense<0.000000e+00> : vector<32x128xf32>
    %84 = tpu.matmul %81, %83, %cst_43 {dimension_numbers = #tpu.dot_dimension_numbers<[1], [0], [0], [1], [0, 0, 1, 1], [], []>} : vector<32x128xbf16>, vector<128x128xbf16>, vector<32x128xf32> -> vector<32x128xf32>
    %85 = arith.truncf %74 : vector<32x128xf32> to vector<32x128xbf16>
    %c1_44 = arith.constant 1 : index
    %c0_45 = arith.constant 0 : index
    %c0_46 = arith.constant 0 : index
    %86 = vector.load %arg4[%c1_44, %c0_45, %c0_46] : memref<3x128x128xbf16, #tpu.memory_space<vmem>>, vector<1x128x128xbf16>
    %87 = vector.shape_cast %86 : vector<1x128x128xbf16> to vector<128x128xbf16>
    %cst_47 = arith.constant dense<0.000000e+00> : vector<32x128xf32>
    %88 = tpu.matmul %85, %87, %cst_47 {dimension_numbers = #tpu.dot_dimension_numbers<[1], [0], [0], [1], [0, 0, 1, 1], [], []>} : vector<32x128xbf16>, vector<128x128xbf16>, vector<32x128xf32> -> vector<32x128xf32>
    %89 = arith.addf %84, %88 : vector<32x128xf32>
    %90 = arith.truncf %80 : vector<32x128xf32> to vector<32x128xbf16>
    %c2_48 = arith.constant 2 : index
    %c0_49 = arith.constant 0 : index
    %c0_50 = arith.constant 0 : index
    %91 = vector.load %arg4[%c2_48, %c0_49, %c0_50] : memref<3x128x128xbf16, #tpu.memory_space<vmem>>, vector<1x128x128xbf16>
    %92 = vector.shape_cast %91 : vector<1x128x128xbf16> to vector<128x128xbf16>
    %cst_51 = arith.constant dense<0.000000e+00> : vector<32x128xf32>
    %93 = tpu.matmul %90, %92, %cst_51 {dimension_numbers = #tpu.dot_dimension_numbers<[1], [0], [0], [1], [0, 0, 1, 1], [], []>} : vector<32x128xbf16>, vector<128x128xbf16>, vector<32x128xf32> -> vector<32x128xf32>
    %94 = arith.addf %89, %93 : vector<32x128xf32>
    %c0_52 = arith.constant 0 : index
    %c0_53 = arith.constant 0 : index
    %95 = vector.load %arg5[%c0_52, %c0_53] : memref<1x8xf32, #tpu.memory_space<vmem>>, vector<1x8xf32>
    %c0_54 = arith.constant 0 : index
    %c0_55 = arith.constant 0 : index
    %96 = vector.load %arg6[%c0_54, %c0_55] : memref<1x8xf32, #tpu.memory_space<vmem>>, vector<1x8xf32>
    %cst_56 = arith.constant dense<0.000000e+00> : vector<128xf32>
    %97 = vector.multi_reduction <add>, %94, %cst_56 [0] : vector<32x128xf32> to vector<128xf32>
    %98 = vector.shape_cast %97 : vector<128xf32> to vector<1x128xf32>
    %99 = arith.mulf %94, %94 : vector<32x128xf32>
    %cst_57 = arith.constant dense<0.000000e+00> : vector<128xf32>
    %100 = vector.multi_reduction <add>, %99, %cst_57 [0] : vector<32x128xf32> to vector<128xf32>
    %101 = vector.shape_cast %100 : vector<128xf32> to vector<1x128xf32>
    %cst_58 = arith.constant dense<0.000000e+00> : vector<1x8xf32>
    %102 = tpu.matmul %98, %1, %cst_58 {dimension_numbers = #tpu.dot_dimension_numbers<[1], [0], [0], [1], [0, 0, 1, 1], [], []>} : vector<1x128xf32>, vector<128x8xf32>, vector<1x8xf32> -> vector<1x8xf32>
    %cst_59 = arith.constant 0.001953125 : f32
    %103 = vector.broadcast %cst_59 : f32 to vector<1x8xf32>
    %104 = arith.mulf %102, %103 : vector<1x8xf32>
    %cst_60 = arith.constant dense<0.000000e+00> : vector<1x8xf32>
    %105 = tpu.matmul %101, %1, %cst_60 {dimension_numbers = #tpu.dot_dimension_numbers<[1], [0], [0], [1], [0, 0, 1, 1], [], []>} : vector<1x128xf32>, vector<128x8xf32>, vector<1x8xf32> -> vector<1x8xf32>
    %cst_61 = arith.constant 0.001953125 : f32
    %106 = vector.broadcast %cst_61 : f32 to vector<1x8xf32>
    %107 = arith.mulf %105, %106 : vector<1x8xf32>
    %108 = arith.mulf %104, %104 : vector<1x8xf32>
    %109 = arith.subf %107, %108 : vector<1x8xf32>
    %cst_62 = arith.constant 0.000000e+00 : f32
    %110 = vector.broadcast %cst_62 : f32 to vector<1x8xf32>
    %111 = arith.maximumf %109, %110 : vector<1x8xf32>
    %cst_63 = arith.constant 9.99999974E-6 : f32
    %112 = vector.broadcast %cst_63 : f32 to vector<1x8xf32>
    %113 = arith.addf %111, %112 : vector<1x8xf32>
    %114 = math.rsqrt %113 : vector<1x8xf32>
    %115 = arith.mulf %95, %114 : vector<1x8xf32>
    %116 = arith.mulf %104, %115 : vector<1x8xf32>
    %117 = arith.subf %96, %116 : vector<1x8xf32>
    %cst_64 = arith.constant dense<0.000000e+00> : vector<1x128xf32>
    %118 = tpu.matmul %115, %2, %cst_64 {dimension_numbers = #tpu.dot_dimension_numbers<[1], [0], [0], [1], [0, 0, 1, 1], [], []>} : vector<1x8xf32>, vector<8x128xf32>, vector<1x128xf32> -> vector<1x128xf32>
    %cst_65 = arith.constant dense<0.000000e+00> : vector<1x128xf32>
    %119 = tpu.matmul %117, %2, %cst_65 {dimension_numbers = #tpu.dot_dimension_numbers<[1], [0], [0], [1], [0, 0, 1, 1], [], []>} : vector<1x8xf32>, vector<8x128xf32>, vector<1x128xf32> -> vector<1x128xf32>
    %120 = vector.broadcast %118 : vector<1x128xf32> to vector<32x128xf32>
    %121 = arith.mulf %94, %120 : vector<32x128xf32>
    %122 = vector.broadcast %119 : vector<1x128xf32> to vector<32x128xf32>
    %123 = arith.addf %121, %122 : vector<32x128xf32>
    %124 = arith.addf %123, %0 : vector<32x128xf32>
    %cst_66 = arith.constant 0.000000e+00 : f32
    %125 = vector.broadcast %cst_66 : f32 to vector<32x128xf32>
    %126 = arith.maximumf %124, %125 : vector<32x128xf32>
    %c0_67 = arith.constant 0 : index
    %c0_68 = arith.constant 0 : index
    %127 = vector.load %arg9[%c0_67, %c0_68] : memref<32x128xf32, #tpu.memory_space<vmem>>, vector<32x128xf32>
    tpu.vector_store %arg9[%c0_67, %c0_68], %126 {strides = array<i32>} : memref<32x128xf32, #tpu.memory_space<vmem>>, vector<32x128xf32>,
    return
  }
}

</mosaic_0001>

<bundles_post_ra>
// kernel: tpu_custom_call.1
= control target key start
LH: loop header
LB: loop body
LE: loop exit
PB: predicated region body
PF: predicated region fallthrough
CT: control target
= control target key end

     0   :  { %14 = vsyncpa [#allocation3], 0  ;;  %s1782_s0 = inlined_call_operand.vmem [shape: f32[32,128], index: 0, kind: input, shape index: {}]   ;;  %s1783_s1 = inlined_call_operand.hbm [shape: bf16[3,128,128], index: 1, kind: input, shape index: {}]   ;;  %s1784_s2 = inlined_call_operand.vmem [shape: f32[1,8], index: 2, kind: input, shape index: {}]   ;;  %s1785_s3 = inlined_call_operand.vmem [shape: f32[1,8], index: 3, kind: input, shape index: {}]   ;;  %s1786_s4 = inlined_call_operand.hbm [shape: bf16[3,128,128], index: 4, kind: input, shape index: {}]   ;;  %s1787_s5 = inlined_call_operand.vmem [shape: f32[1,8], index: 5, kind: input, shape index: {}]   ;;  %s1788_s6 = inlined_call_operand.vmem [shape: f32[1,8], index: 6, kind: input, shape index: {}]   ;;  %s1789_s7 = inlined_call_operand.vmem [shape: f32[128,8], index: 7, kind: input, shape index: {}]   ;;  %s1790_s8 = inlined_call_operand.vmem [shape: f32[8,128], index: 8, kind: input, shape index: {}]   ;;  %s1791_s9 = inlined_call_operand.hbm [shape: f32[32,128], index: 9, kind: output, shape index: {}]  }
   0x1   :  { %15 = vsyncpa [#allocation6], 0 }
   0x2   :  { %16 = vsyncpa [#allocation4], 0  ;;  %s23_s11 = sshll.u32 %s1783_s1, 4  ;;  %s1404_s12 = smov [#allocation2]   ;;  %s24_s11 = int_to_ptr.hbm [resolvable:$true] %s23_s11 }
   0x3   :  { %s25_s13 = sshll.u32 %s1404_s12, 4  ;;  %s40_s16 = sshll.u32 %s1786_s4, 4  ;;  %s26_s13 = int_to_ptr.vmem [resolvable:$true] %s25_s13  ;;  %s41_s16 = int_to_ptr.hbm [resolvable:$true] %s40_s16 }
   0x4   :  { %s1405_s17 = smov 64   ;;  %s1406_s18 = smov 4  }
   0x5   :  { %31 = dma.hbm_to_vmem [thread:$0]  %s24_s11, 3072, %s26_s13, [#allocation3], %s1405_s17, %s1405_s17, %s1406_s18  }
   0x6   :  { %s1407_s19 = smov [#allocation5]  }
   0x7   :  { %s42_s20 = sshll.u32 %s1407_s19, 4  ;;  %s43_s20 = int_to_ptr.vmem [resolvable:$true] %s42_s20 }
   0x8   :  { %48 = dma.hbm_to_vmem [thread:$0]  %s41_s16, 3072, %s43_s20, [#allocation6], %s1405_s17, %s1405_s17, %s1406_s18  }
   0x9   :  { %1398 = dma.done.wait [#allocation3], 3072  }
   0xa   :  { %1399 = vsyncadd [#allocation3], 4294964224 }
   0xb   :  { %1400 = dma.done.wait [#allocation6], 3072  }
   0xc   :  { %1401 = vsyncadd [#allocation6], 4294964224  ;;  %v1277_v0 = vld [vmem:[#allocation2 + $0x78] sm:$0xff]  ;;  %v1276_v3 = vld [vmem:[#allocation2 + $0x70] sm:$0xff]  ;;  %v86_v12 = vlaneseq  ;;  %vm1408_vm4 = vmmov 1   ;;  %vm517_vm14 = vcmask 64512  }
   0xd   :  { %v1269_v1 = vld [vmem:[#allocation2 + $0x38] sm:$0xff]  ;;  %258 = vmatpush.bf16.msra.mxu0 %v1277_v0  ;;  %v1268_v4 = vld [vmem:[#allocation2 + $0x30] sm:$0xff]  ;;  %v1275_v6 = vld [vmem:[#allocation2 + $0x68] sm:$0xff]  ;;  %s1020_s1 = sshll.u32 %s1791_s9, 4  ;;  %s1410_s4 = smov 128   ;;  %s1021_s1 = int_to_ptr.hbm [resolvable:$true] %s1020_s1 }
   0xe   :  { %v1285_v2 = vld [vmem:[#allocation2 + $0xb8] sm:$0xff]  ;;  %325 = vmatpush.bf16.msra.mxu1 %v1269_v1  ;;  %v1284_v5 = vld [vmem:[#allocation2 + $0xb0] sm:$0xff]  ;;  %v1267_v7 = vld [vmem:[#allocation2 + $0x28] sm:$0xff]  ;;  %v1468_v16 = vshrl.u32 %v86_v12, 7  ;;  %s1411_s21 = smov 8  }
   0xf   :  { %411 = vmatpush.bf16.msra.mxu2 %v1285_v2  ;;  %v1283_v8 = vld [vmem:[#allocation2 + $0xa8] sm:$0xff]  ;;  %v1274_v9 = vld [vmem:[#allocation2 + $0x60] sm:$0xff]  ;;  %v1273_v13 = vld [vmem:[#allocation2 + $0x58] sm:$0xff] }
  0x10   :  { %v1266_v10 = vld [vmem:[#allocation2 + $0x20] sm:$0xff]  ;;  %v1265_v14 = vld [vmem:[#allocation2 + $0x18] sm:$0xff]  ;;  %v1272_v17 = vld [vmem:[#allocation2 + $0x50] sm:$0xff]  ;;  %v88_v24 = vadd.s32 8, %v1468_v16  ;;  %v95_v27 = vand.u32 15, %v1468_v16  ;;  %vm151_vm0 = vcmp.lt.s32.totalorder %v1468_v16, 1 }
  0x11   :  { %259 = vmatpush.bf16.msra.mxu0 %v1276_v3  ;;  %v1282_v11 = vld [vmem:[#allocation2 + $0xa0] sm:$0xff]  ;;  %v1281_v15 = vld [vmem:[#allocation2 + $0x98] sm:$0xff]  ;;  %v1264_v18 = vld [vmem:[#allocation2 + $0x10] sm:$0xff]  ;;  %vm164_vm1 = vcmp.lt.s32.totalorder %v1468_v16, 7  ;;  %v89_v48 = vadd.s32 16, %v1468_v16  ;;  %v90_v49 = vadd.s32 24, %v1468_v16 }
  0x12   :  { %326 = vmatpush.bf16.msra.mxu1 %v1268_v4  ;;  %v1280_v19 = vld [vmem:[#allocation2 + $0x90] sm:$0xff]  ;;  %v1473_v20 = vld [vmem:[%s1782_s0] sm:$0xff]  ;;  %v1478_v21 = vld [vmem:[%s1782_s0 + $0x8] sm:$0xff]  ;;  %v102_v35 = vand.u32 15, %v88_v24  ;;  %vm1310_vm2 = vcmp.ne.s32.totalorder %v95_v27, 0 }
  0x13   :  { %412 = vmatpush.bf16.msra.mxu2 %v1284_v5  ;;  %v1483_v22 = vld [vmem:[%s1782_s0 + $0x18] sm:$0xff]  ;;  %v1488_v23 = vld [vmem:[%s1782_s0 + $0x10] sm:$0xff]  ;;  %v1271_v25 = vld [vmem:[#allocation2 + $0x48] sm:$0xff]  ;;  %v147_v28 = vrot.slane %v1473_v20, 7  ;;  %v148_v29 = vrot.slane %v1478_v21, 7  ;;  %v160_v32 = vrot.slane %v1473_v20, 1  ;;  %v191_v43 = vpack.c.bf16 %v1478_v21, %v1473_v20 }
  0x14   :  { %v1263_v26 = vld [vmem:[#allocation2 + $0x8] sm:$0xff]  ;;  %v150_v30 = vrot.slane %v1483_v22, 7  ;;  %v161_v33 = vrot.slane %v1478_v21, 1  ;;  %v162_v34 = vrot.slane %v1488_v23, 1  ;;  %v1270_v36 = vld [vmem:[#allocation2 + $0x40] sm:$0xff]  ;;  %vm1312_vm3 = vcmp.ne.s32.totalorder %v102_v35, 15  ;;  %vm1511_vm5 = vmpackc.low %vm1408_vm4, %vm1310_vm2 }
  0x15   :  { %260 = vmatpush.bf16.msra.mxu0 %v1275_v6  ;;  %v1279_v31 = vld [vmem:[#allocation2 + $0x88] sm:$0xff]  ;;  %v1262_v37 = vld [vmem:[#allocation2] sm:$0xff]  ;;  %v154_v38 = vsel %vm151_vm0, %v147_v28, %v148_v29  ;;  %vm1516_vm6 = vmpackc.low %vm1312_vm3, %vm1408_vm4  ;;  %v149_v50 = vrot.slane %v1488_v23, 7  ;;  %v109_v51 = vand.u32 15, %v89_v48  ;;  %v163_v52 = vrot.slane %v1483_v22, 1 }
  0x16   :  { %327 = vmatpush.bf16.msra.mxu1 %v1267_v7  ;;  %v155_v39 = vsel %vm151_vm0, %v150_v30, %v147_v28  ;;  %v1278_v40 = vld [vmem:[#allocation2 + $0x80] sm:$0xff]  ;;  %v166_v41 = vsel %vm164_vm1, %v161_v33, %v162_v34  ;;  %v167_v42 = vsel %vm164_vm1, %v160_v32, %v161_v33  ;;  %v116_v53 = vand.u32 15, %v90_v49  ;;  %v1555_v63 = vld [vmem:[%s1789_s7 + $0x78] sm:$0xff]  ;;  %v1562_v0 = vld [vmem:[%s1789_s7 + $0x70] sm:$0xff] }
  0x17   :  { %413 = vmatpush.bf16.msra.mxu2 %v1283_v8  ;;  %v1100_v44 = vpack.c.bf16 %v154_v38, %v155_v39  ;;  %v1140_v46 = vpack.c.bf16 %v166_v41, %v167_v42  ;;  %v152_v54 = vsel %vm151_vm0, %v149_v50, %v150_v30  ;;  %v153_v55 = vsel %vm151_vm0, %v148_v29, %v149_v50  ;;  %v1569_v1 = vld [vmem:[%s1789_s7 + $0x68] sm:$0xff]  ;;  %v1576_v2 = vld [vmem:[%s1789_s7 + $0x60] sm:$0xff]  ;;  %v1583_v3 = vld [vmem:[%s1789_s7 + $0x58] sm:$0xff] }
  0x18   :  { %vm1311_vm7 = vcmp.ne.s32.totalorder %v109_v51, 0  ;;  %v165_v56 = vsel %vm164_vm1, %v162_v34, %v163_v52  ;;  %v168_v57 = vsel %vm164_vm1, %v163_v52, %v160_v32  ;;  %vm1313_vm8 = vcmp.ne.s32.totalorder %v116_v53, 15  ;;  %458 = vmatpush.msra.mxu3 %v1555_v63  ;;  %v1590_v4 = vld [vmem:[%s1789_s7 + $0x50] sm:$0xff]  ;;  %v1597_v5 = vld [vmem:[%s1789_s7 + $0x48] sm:$0xff]  ;;  %v1604_v6 = vld [vmem:[%s1789_s7 + $0x40] sm:$0xff] }
  0x19   :  { %261 = vmatpush.bf16.msra.mxu0 %v1274_v9  ;;  %v192_v58 = vpack.c.bf16 %v1483_v22, %v1488_v23  ;;  %v1104_v59 = vpack.c.bf16 %v152_v54, %v153_v55  ;;  %vm1539_vm9 = vmpackc.low %vm1408_vm4, %vm1311_vm7  ;;  %v1144_v61 = vpack.c.bf16 %v168_v57, %v165_v56  ;;  %v1611_v9 = vld [vmem:[%s1789_s7 + $0x38] sm:$0xff]  ;;  %v1632_v12 = vld [vmem:[%s1789_s7 + $0x20] sm:$0xff] }
  0x1a   :  { %328 = vmatpush.bf16.msra.mxu1 %v1266_v10  ;;  %vm1544_vm10 = vmpackc.low %vm1313_vm8, %vm1408_vm4  ;;  %459 = vmatpush.msra.mxu3 %v1562_v0  ;;  %v1618_v10 = vld [vmem:[%s1789_s7 + $0x30] sm:$0xff]  ;;  %v1658_v24 = vld [vmem:[%s1789_s7] sm:$0xff] }
  0x1b   :  { %414 = vmatpush.bf16.msra.mxu2 %v1282_v11  ;;  %v1625_v11 = vld [vmem:[%s1789_s7 + $0x28] sm:$0xff] }
  0x1c   :  { %460 = vmatpush.msra.mxu3 %v1569_v1 }
  0x1d   :  { %262 = vmatpush.bf16.msra.mxu0 %v1273_v13  ;;  %v1637_v13 = vld [vmem:[%s1789_s7 + $0x18] sm:$0xff] }
  0x1e   :  { %329 = vmatpush.bf16.msra.mxu1 %v1265_v14  ;;  %461 = vmatpush.msra.mxu3 %v1576_v2 }
  0x1f   :  { %415 = vmatpush.bf16.msra.mxu2 %v1281_v15 }
  0x20   :  { %462 = vmatpush.msra.mxu3 %v1583_v3 }
  0x21   :  { %263 = vmatpush.bf16.msra.mxu0 %v1272_v17 }
  0x22   :  { %330 = vmatpush.bf16.msra.mxu1 %v1264_v18  ;;  %463 = vmatpush.msra.mxu3 %v1590_v4  ;;  %v1644_v18 = vld [vmem:[%s1789_s7 + $0x10] sm:$0xff] }
  0x23   :  { %416 = vmatpush.bf16.msra.mxu2 %v1280_v19  ;;  %v1651_v19 = vld [vmem:[%s1789_s7 + $0x8] sm:$0xff] }
  0x24   :  { %464 = vmatpush.msra.mxu3 %v1597_v5 }
  0x25   :  { %264 = vmatpush.bf16.msra.mxu0 %v1271_v25 }
  0x26   :  { %331 = vmatpush.bf16.msra.mxu1 %v1263_v26  ;;  %465 = vmatpush.msra.mxu3 %v1604_v6 }
  0x27   :  { %417 = vmatpush.bf16.msra.mxu2 %v1279_v31 }
  0x28   :  { %466 = vmatpush.msra.mxu3 %v1611_v9 }
  0x29   :  { %265 = vmatpush.bf16.msra.mxu0 %v1270_v36 }
  0x2a   :  { %332 = vmatpush.bf16.msra.mxu1 %v1262_v37  ;;  %467 = vmatpush.msra.mxu3 %v1618_v10 }
  0x2b   :  { %418 = vmatpush.bf16.msra.mxu2 %v1278_v40 }
  0x2c   :  { %266 = vmatmul.bf16.vlgmr.msra.gmra.mxu0 %v191_v43  ;;  %468 = vmatpush.msra.mxu3 %v1625_v11 }
  0x2d   :  { %1101 = vmatmul.msk.bf16.vlgmr.msra.gmra.mxu1 %vm1511_vm5, %v1100_v44  ;;  %479 = vmatpush.msrb.mxu0 %v1555_v63 }
  0x2e   :  { %1141 = vmatmul.msk.bf16.vlgmr.msra.gmra.mxu2 %vm1516_vm6, %v1140_v46  ;;  %469 = vmatpush.msra.mxu3 %v1632_v12 }
  0x2f   :  { %480 = vmatpush.msrb.mxu0 %v1562_v0 }
  0x30   :  { %470 = vmatpush.msra.mxu3 %v1637_v13 }
  0x31   :  { %481 = vmatpush.msrb.mxu0 %v1569_v1 }
  0x32   :  { %471 = vmatpush.msra.mxu3 %v1644_v18 }
  0x33   :  { %482 = vmatpush.msrb.mxu0 %v1576_v2 }
  0x34   :  { %472 = vmatpush.msra.mxu3 %v1651_v19 }
  0x35   :  { %483 = vmatpush.msrb.mxu0 %v1583_v3 }
  0x36   :  { %473 = vmatpush.msra.mxu3 %v1658_v24 }
  0x37   :  { %484 = vmatpush.msrb.mxu0 %v1590_v4 }
  0x39   :  { %485 = vmatpush.msrb.mxu0 %v1597_v5 }
  0x3b   :  { %486 = vmatpush.msrb.mxu0 %v1604_v6 }
  0x3c   :  { %271 = vmatmul.bf16.gmra.mxu0 %v192_v58 }
  0x3d   :  { %1105 = vmatmul.msk.bf16.gmra.mxu1 %vm1539_vm9, %v1104_v59  ;;  %487 = vmatpush.msrb.mxu0 %v1611_v9 }
  0x3e   :  { %1145 = vmatmul.msk.bf16.gmra.mxu2 %vm1544_vm10, %v1144_v61 }
  0x3f   :  { %488 = vmatpush.msrb.mxu0 %v1618_v10 }
  0x41   :  { %489 = vmatpush.msrb.mxu0 %v1625_v11 }
  0x43   :  { %490 = vmatpush.msrb.mxu0 %v1632_v12 }
  0x45   :  { %491 = vmatpush.msrb.mxu0 %v1637_v13 }
  0x47   :  { %492 = vmatpush.msrb.mxu0 %v1644_v18 }
  0x49   :  { %493 = vmatpush.msrb.mxu0 %v1651_v19 }
  0x4b   :  { %494 = vmatpush.msrb.mxu0 %v1658_v24 }
  0x4d   :  { %887 = vmatpush.msra.mxu0 %v1555_v63 }
  0x4f   :  { %888 = vmatpush.msra.mxu0 %v1562_v0 }
  0x51   :  { %889 = vmatpush.msra.mxu0 %v1569_v1 }
  0x53   :  { %890 = vmatpush.msra.mxu0 %v1576_v2 }
  0x55   :  { %891 = vmatpush.msra.mxu0 %v1583_v3 }
  0x57   :  { %892 = vmatpush.msra.mxu0 %v1590_v4 }
  0x59   :  { %893 = vmatpush.msra.mxu0 %v1597_v5 }
  0x5b   :  { %894 = vmatpush.msra.mxu0 %v1604_v6 }
  0x5d   :  { %895 = vmatpush.msra.mxu0 %v1611_v9 }
  0x5f   :  { %896 = vmatpush.msra.mxu0 %v1618_v10 }
  0x61   :  { %897 = vmatpush.msra.mxu0 %v1625_v11 }
  0x63   :  { %898 = vmatpush.msra.mxu0 %v1632_v12 }
  0x65   :  { %899 = vmatpush.msra.mxu0 %v1637_v13 }
  0x67   :  { %900 = vmatpush.msra.mxu0 %v1644_v18 }
  0x69   :  { %901 = vmatpush.msra.mxu0 %v1651_v19 }
  0x6b   :  { %902 = vmatpush.msra.mxu0 %v1658_v24 }
  0xa9   :  { %v267_v7 = vpop.f32.mrf.mxu0 }
  0xaa   :  { %v334_v8 = vpop.f32.mrf.mxu1 }
  0xab   :  { %v335_v28 = vadd.f32 %v334_v8, %v267_v7 }
  0xb1   :  { %v420_v14 = vpop.f32.mrf.mxu2  ;;  %v269_v15 = vpop.f32.mrf.mxu0 }
  0xb2   :  { %v336_v17 = vpop.f32.mrf.mxu1  ;;  %v1671_v33 = vadd.f32 %v420_v14, %v335_v28 }
  0xb3   :  { %v337_v29 = vadd.f32 %v336_v17, %v269_v15  ;;  %v1703_v15 = vld [vmem:[%s1790_s8] sm:$0xff] }
  0xb4   :  { %v445_v38 = vmul.f32 %v1671_v33, %v1671_v33  ;;  %536 = vmatpush.msrb.mxu3 %v1703_v15 }
  0xb9   :  { %v422_v25 = vpop.f32.mrf.mxu2  ;;  %v272_v26 = vpop.f32.mrf.mxu0 }
  0xba   :  { %v339_v27 = vpop.f32.mrf.mxu1  ;;  %v1668_v32 = vadd.f32 %v422_v25, %v337_v29 }
  0xbb   :  { %v340_v30 = vadd.f32 %v339_v27, %v272_v26 }
  0xbc   :  { %v446_v37 = vmul.f32 %v1668_v32, %v1668_v32  ;;  %v436_v39 = vadd.f32 %v1668_v32, %v1671_v33 }
  0xbe   :  { %v449_v43 = vadd.f32 %v446_v37, %v445_v38  ;;  %v1300_v37 = vld [vmem:[#allocation5 + $0x70] sm:$0xff] }
  0xbf   :  { %v1292_v38 = vld [vmem:[#allocation5 + $0x30] sm:$0xff] }
  0xc1   :  { %v425_v31 = vpop.f32.mrf.mxu2  ;;  %v274_v35 = vpop.f32.mrf.mxu0 }
  0xc2   :  { %v1673_v34 = vadd.f32 %v425_v31, %v340_v30  ;;  %v341_v36 = vpop.f32.mrf.mxu1  ;;  %v1301_v31 = vld [vmem:[#allocation5 + $0x78] sm:$0xff] }
  0xc3   :  { %v342_v41 = vadd.f32 %v341_v36, %v274_v35  ;;  %v1293_v35 = vld [vmem:[#allocation5 + $0x38] sm:$0xff]  ;;  %687 = vmatpush.bf16.msrb.mxu1 %v1301_v31  ;;  %v1294_v31 = vld [vmem:[#allocation5 + $0x40] sm:$0xff] }
  0xc4   :  { %v447_v40 = vmul.f32 %v1673_v34, %v1673_v34  ;;  %v437_v44 = vadd.f32 %v436_v39, %v1673_v34  ;;  %754 = vmatpush.bf16.msrb.mxu2 %v1293_v35  ;;  %v1299_v39 = vld [vmem:[#allocation5 + $0x68] sm:$0xff]  ;;  %v1286_v35 = vld [vmem:[#allocation5] sm:$0xff] }
  0xc6   :  { %v450_v48 = vadd.f32 %v449_v43, %v447_v40  ;;  %v1291_v40 = vld [vmem:[#allocation5 + $0x28] sm:$0xff] }
  0xc7   :  { %688 = vmatpush.bf16.msrb.mxu1 %v1300_v37 }
  0xc8   :  { %755 = vmatpush.bf16.msrb.mxu2 %v1292_v38 }
  0xc9   :  { %v427_v42 = vpop.f32.mrf.mxu2 }
  0xca   :  { %v1687_v46 = vadd.f32 %v427_v42, %v342_v41  ;;  %v1298_v42 = vld [vmem:[#allocation5 + $0x60] sm:$0xff] }
  0xcb   :  { %689 = vmatpush.bf16.msrb.mxu1 %v1299_v39 }
  0xcc   :  { %v438_v49 = vadd.f32 %v437_v44, %v1687_v46  ;;  %v448_v50 = vmul.f32 %v1687_v46, %v1687_v46  ;;  %756 = vmatpush.bf16.msrb.mxu2 %v1291_v40 }
  0xce   :  { %v439_v51 = vrot.slane %v438_v49, 4  ;;  %v451_v52 = vadd.f32 %v450_v48, %v448_v50  ;;  %v434_v50 = vld [vmem:[%s1784_s2] sm:$0x1] }
  0xcf   :  { %690 = vmatpush.bf16.msrb.mxu1 %v1298_v42 }
  0xd0   :  { %v452_v53 = vrot.slane %v451_v52, 4  ;;  %v440_v54 = vadd.f32 %v439_v51, %v438_v49 }
  0xd2   :  { %v441_v55 = vrot.slane %v440_v54, 2  ;;  %v453_v56 = vadd.f32 %v452_v53, %v451_v52  ;;  %v1309_v53 = vld [vmem:[#allocation5 + $0xb8] sm:$0xff] }
  0xd4   :  { %v442_v57 = vadd.f32 %v441_v55, %v440_v54  ;;  %v454_v58 = vrot.slane %v453_v56, 2  ;;  %v1308_v55 = vld [vmem:[#allocation5 + $0xb0] sm:$0xff] }
  0xd6   :  { %v443_v59 = vrot.slane %v442_v57, 1  ;;  %v455_v61 = vadd.f32 %v454_v58, %v453_v56  ;;  %v1307_v58 = vld [vmem:[#allocation5 + $0xa8] sm:$0xff] }
  0xd8   :  { %v444_v7 = vadd.f32 %v443_v59, %v442_v57  ;;  %v456_v8 = vrot.slane %v455_v61, 1  ;;  %v435_v57 = vld [vmem:[%s1785_s3] sm:$0x1] }
  0xda   :  { %474 = vmatmul.f32.vlgmr.msra.gmra.mxu3 %v444_v7  ;;  %v457_v14 = vadd.f32 %v456_v8, %v455_v61  ;;  %v1290_v61 = vld [vmem:[#allocation5 + $0x20] sm:$0xff]  ;;  %v1297_v8 = vld [vmem:[#allocation5 + $0x58] sm:$0xff] }
  0xdb   :  { %559 = vmatpush.msra.mxu3 %v1703_v15  ;;  %v1306_v7 = vld [vmem:[#allocation5 + $0xa0] sm:$0xff]  ;;  %757 = vmatpush.bf16.msrb.mxu2 %v1290_v61 }
  0xdc   :  { %495 = vmatmul.f32.vlgmr.msrb.gmra.mxu0 %v457_v14  ;;  %691 = vmatpush.bf16.msrb.mxu1 %v1297_v8  ;;  %v1289_v14 = vld [vmem:[#allocation5 + $0x18] sm:$0xff] }
  0xdd   :  { %987 = vmatpush.msrb.mxu0 %v1703_v15 }
  0xdf   :  { %758 = vmatpush.bf16.msrb.mxu2 %v1289_v14 }
 0x159   :  { %v496_v17 = vpop.f32.mrf.mxu0 }
 0x15a   :  { %v499_v27 = vmul.f32 0.001953125, %v496_v17  ;;  %v1305_v17 = vld [vmem:[#allocation5 + $0x98] sm:$0xff] }
 0x15d   :  { %v475_v25 = vpop.f32.mrf.mxu3 }
 0x15e   :  { %v478_v26 = vmul.f32 0.001953125, %v475_v25  ;;  %v1296_v25 = vld [vmem:[#allocation5 + $0x50] sm:$0xff] }
 0x15f   :  { %692 = vmatpush.bf16.msrb.mxu1 %v1296_v25 }
 0x160   :  { %v500_v28 = vmul.f32 %v478_v26, %v478_v26 }
 0x162   :  { %v501_v29 = vsub.f32 %v499_v27, %v500_v28  ;;  %v1304_v27 = vld [vmem:[#allocation5 + $0x90] sm:$0xff]  ;;  %v1295_v28 = vld [vmem:[#allocation5 + $0x48] sm:$0xff] }
 0x163   :  { %693 = vmatpush.bf16.msrb.mxu1 %v1295_v28 }
 0x164   :  { %v502_v30 = vmax.f32 %v501_v29, 0.0  ;;  %v1287_v29 = vld [vmem:[#allocation5 + $0x8] sm:$0xff] }
 0x166   :  { %v503_v36 = vadd.f32 1e-05, %v502_v30  ;;  %v1303_v30 = vld [vmem:[#allocation5 + $0x88] sm:$0xff] }
 0x167   :  { %694 = vmatpush.bf16.msrb.mxu1 %v1294_v31 }
 0x168   :  { %1322 = vrsqrt.f32 %v503_v36  ;;  %vm510_vm12 = vweird.f32 %v503_v36 }
 0x16b   :  { %908 = vmatpush.msra.mxu1 %v1555_v63 }
 0x16d   :  { %909 = vmatpush.msra.mxu1 %v1562_v0 }
 0x16e   :  { %v1323_v41 = vpop.eup %1322 }
 0x16f   :  { %v505_v43 = vmul.f32 %v1323_v41, %v503_v36  ;;  %vm511_vm11 = vweird.f32 %v1323_v41  ;;  %v1302_v36 = vld [vmem:[#allocation5 + $0x80] sm:$0xff]  ;;  %910 = vmatpush.msra.mxu1 %v1569_v1 }
 0x170   :  { %vm512_vm13 = vmor %vm510_vm12, %vm511_vm11 }
 0x171   :  { %v506_v44 = vmul.f32 %v1323_v41, %v505_v43  ;;  %911 = vmatpush.msra.mxu1 %v1576_v2 }
 0x173   :  { %v507_v48 = vmul.f32 0.5, %v506_v44  ;;  %912 = vmatpush.msra.mxu1 %v1583_v3 }
 0x175   :  { %v508_v49 = vsub.f32 1.5, %v507_v48  ;;  %913 = vmatpush.msra.mxu1 %v1590_v4 }
 0x177   :  { %v509_v51 = vmul.f32 %v1323_v41, %v508_v49  ;;  %914 = vmatpush.msra.mxu1 %v1597_v5 }
 0x179   :  { %v513_v52 = vsel %vm512_vm13, %v1323_v41, %v509_v51  ;;  %915 = vmatpush.msra.mxu1 %v1604_v6 }
 0x17a   :  { %v514_v54 = vmul.f32 %v513_v52, %v434_v50 }
 0x17b   :  { %916 = vmatpush.msra.mxu1 %v1611_v9 }
 0x17c   :  { %1146 = vmatmul.msk.f32.vlgmr.msrb.gmra.mxu3 %vm517_vm14, %v514_v54  ;;  %v515_v56 = vmul.f32 %v514_v54, %v478_v26  ;;  %v1288_v26 = vld [vmem:[#allocation5 + $0x10] sm:$0xff] }
 0x17d   :  { %840 = vmatpush.bf16.msrb.mxu3 %v1309_v53  ;;  %759 = vmatpush.bf16.msrb.mxu2 %v1288_v26 }
 0x17e   :  { %v516_v59 = vsub.f32 %v435_v57, %v515_v56  ;;  %917 = vmatpush.msra.mxu1 %v1618_v10 }
 0x180   :  { %918 = vmatpush.msra.mxu1 %v1625_v11 }
 0x181   :  { %841 = vmatpush.bf16.msrb.mxu3 %v1308_v55  ;;  %760 = vmatpush.bf16.msrb.mxu2 %v1287_v29 }
 0x182   :  { %919 = vmatpush.msra.mxu1 %v1632_v12 }
 0x184   :  { %1147 = vmatmul.msk.f32.vlgmr.msra.gmra.mxu3 %vm517_vm14, %v516_v59  ;;  %920 = vmatpush.msra.mxu1 %v1637_v13 }
 0x185   :  { %842 = vmatpush.bf16.msrb.mxu3 %v1307_v58  ;;  %761 = vmatpush.bf16.msrb.mxu2 %v1286_v35 }
 0x186   :  { %921 = vmatpush.msra.mxu1 %v1644_v18 }
 0x188   :  { %922 = vmatpush.msra.mxu1 %v1651_v19 }
 0x189   :  { %843 = vmatpush.bf16.msrb.mxu3 %v1306_v7  ;;  %964 = vmatpush.msra.mxu2 %v1703_v15 }
 0x18a   :  { %923 = vmatpush.msra.mxu1 %v1658_v24 }
 0x18d   :  { %844 = vmatpush.bf16.msrb.mxu3 %v1305_v17 }
 0x191   :  { %845 = vmatpush.bf16.msrb.mxu3 %v1304_v27 }
 0x195   :  { %846 = vmatpush.bf16.msrb.mxu3 %v1303_v30 }
 0x199   :  { %847 = vmatpush.bf16.msrb.mxu3 %v1302_v36 }
 0x1ff   :  { %v538_v37 = vpop.f32.mrf.mxu3 }
 0x200   :  { %v564_v63 = vperm.slane %v538_v37, 0 }
 0x202   :  { %v565_v0 = vmul.f32 %v564_v63, %v1671_v33  ;;  %v566_v2 = vmul.f32 %v564_v63, %v1668_v32  ;;  %v567_v3 = vmul.f32 %v564_v63, %v1673_v34  ;;  %v568_v4 = vmul.f32 %v564_v63, %v1687_v46 }
 0x207   :  { %v561_v1 = vpop.f32.mrf.mxu3 }
 0x208   :  { %v569_v5 = vperm.slane %v561_v1, 0 }
 0x20a   :  { %v570_v6 = vadd.f32 %v569_v5, %v565_v0  ;;  %v571_v9 = vadd.f32 %v569_v5, %v566_v2  ;;  %v572_v10 = vadd.f32 %v569_v5, %v567_v3  ;;  %v573_v11 = vadd.f32 %v569_v5, %v568_v4 }
 0x20c   :  { %v576_v12 = vmax.f32 %v572_v10, 0.0  ;;  %v577_v33 = vmax.f32 %v573_v11, 0.0  ;;  %v574_v15 = vmax.f32 %v570_v6, 0.0  ;;  %v575_v38 = vmax.f32 %v571_v9, 0.0 }
 0x20e   :  { %v592_v13 = vrot.slane %v576_v12, 1  ;;  %v590_v32 = vrot.slane %v574_v15, 1  ;;  %v591_v34 = vrot.slane %v575_v38, 1  ;;  %v620_v39 = vpack.c.bf16 %v575_v38, %v574_v15 }
 0x20f   :  { %v578_v46 = vrot.slane %v574_v15, 7  ;;  %v579_v40 = vrot.slane %v575_v38, 7  ;;  %v581_v41 = vrot.slane %v577_v33, 7  ;;  %v593_v48 = vrot.slane %v577_v33, 1 }
 0x210   :  { %695 = vmatmul.bf16.vlgmr.msrb.gmra.mxu1 %v620_v39  ;;  %v595_v18 = vsel %vm164_vm1, %v591_v34, %v592_v13  ;;  %v596_v19 = vsel %vm164_vm1, %v590_v32, %v591_v34  ;;  %v580_v49 = vrot.slane %v576_v12, 7  ;;  %v621_v50 = vpack.c.bf16 %v577_v33, %v576_v12 }
 0x211   :  { %v584_v42 = vsel %vm151_vm0, %v578_v46, %v579_v40  ;;  %v585_v24 = vsel %vm151_vm0, %v581_v41, %v578_v46  ;;  %v1254_v43 = vpack.c.bf16 %v595_v18, %v596_v19  ;;  %v594_v51 = vsel %vm164_vm1, %v592_v13, %v593_v48 }
 0x212   :  { %v1214_v44 = vpack.c.bf16 %v584_v42, %v585_v24  ;;  %v597_v52 = vsel %vm164_vm1, %v593_v48, %v590_v32  ;;  %v582_v53 = vsel %vm151_vm0, %v580_v49, %v581_v41  ;;  %v583_v54 = vsel %vm151_vm0, %v579_v40, %v580_v49 }
 0x213   :  { %1255 = vmatmul.msk.bf16.vlgmr.msrb.gmra.mxu3 %vm1516_vm6, %v1254_v43  ;;  %v1258_v47 = vpack.c.bf16 %v597_v52, %v594_v51  ;;  %v1218_v55 = vpack.c.bf16 %v582_v53, %v583_v54  ;;  %v863_v52 = vld [vmem:[%s1787_s5] sm:$0x1]  ;;  %s1409_s5 = smov [#allocation7]  }
 0x214   :  { %1215 = vmatmul.msk.bf16.vlgmr.msrb.gmra.mxu2 %vm1511_vm5, %v1214_v44 }
 0x220   :  { %700 = vmatmul.bf16.gmra.mxu1 %v621_v50 }
 0x223   :  { %1259 = vmatmul.msk.bf16.gmra.mxu3 %vm1544_vm10, %v1258_v47 }
 0x224   :  { %1219 = vmatmul.msk.bf16.gmra.mxu2 %vm1539_vm9, %v1218_v55  ;;  %v864_v55 = vld [vmem:[%s1788_s6] sm:$0x1]  ;;  %s1018_s6 = sshll.u32 %s1409_s5, 4  ;;  %s1019_s6 = int_to_ptr.vmem [resolvable:$true] %s1018_s6 }
 0x28d   :  { %v696_v45 = vpop.f32.mrf.mxu1 }
 0x295   :  { %v698_v58 = vpop.f32.mrf.mxu1 }
 0x296   :  { %v849_v56 = vpop.f32.mrf.mxu3 }
 0x297   :  { %v763_v57 = vpop.f32.mrf.mxu2 }
 0x298   :  { %v764_v17 = vadd.f32 %v763_v57, %v696_v45 }
 0x29a   :  { %v859_v27 = vadd.f32 %v849_v56, %v764_v17 }
 0x29c   :  { %v874_v30 = vmul.f32 %v859_v27, %v859_v27 }
 0x29d   :  { %v701_v7 = vpop.f32.mrf.mxu1 }
 0x29e   :  { %v851_v59 = vpop.f32.mrf.mxu3 }
 0x29f   :  { %v765_v61 = vpop.f32.mrf.mxu2 }
 0x2a0   :  { %v766_v8 = vadd.f32 %v765_v61, %v698_v58 }
 0x2a2   :  { %v1761_v26 = vadd.f32 %v851_v59, %v766_v8 }
 0x2a4   :  { %v875_v60 = vmul.f32 %v1761_v26, %v1761_v26  ;;  %v865_v31 = vadd.f32 %v1761_v26, %v859_v27 }
 0x2a5   :  { %v703_v28 = vpop.f32.mrf.mxu1 }
 0x2a6   :  { %v854_v16 = vpop.f32.mrf.mxu3  ;;  %v878_v63 = vadd.f32 %v875_v60, %v874_v30 }
 0x2a7   :  { %v768_v14 = vpop.f32.mrf.mxu2 }
 0x2a8   :  { %v769_v25 = vadd.f32 %v768_v14, %v701_v7 }
 0x2aa   :  { %v861_v62 = vadd.f32 %v854_v16, %v769_v25 }
 0x2ac   :  { %v876_v35 = vmul.f32 %v861_v62, %v861_v62  ;;  %v866_v0 = vadd.f32 %v865_v31, %v861_v62 }
 0x2ae   :  { %v856_v37 = vpop.f32.mrf.mxu3  ;;  %v879_v2 = vadd.f32 %v878_v63, %v876_v35 }
 0x2af   :  { %v770_v29 = vpop.f32.mrf.mxu2 }
 0x2b0   :  { %v771_v36 = vadd.f32 %v770_v29, %v703_v28 }
 0x2b2   :  { %v862_v1 = vadd.f32 %v856_v37, %v771_v36 }
 0x2b4   :  { %v867_v3 = vadd.f32 %v866_v0, %v862_v1  ;;  %v877_v4 = vmul.f32 %v862_v1, %v862_v1 }
 0x2b6   :  { %v868_v5 = vrot.slane %v867_v3, 4  ;;  %v880_v6 = vadd.f32 %v879_v2, %v877_v4 }
 0x2b8   :  { %v869_v9 = vadd.f32 %v868_v5, %v867_v3  ;;  %v881_v10 = vrot.slane %v880_v6, 4 }
 0x2ba   :  { %v870_v11 = vrot.slane %v869_v9, 2  ;;  %v882_v12 = vadd.f32 %v881_v10, %v880_v6 }
 0x2bc   :  { %v871_v33 = vadd.f32 %v870_v11, %v869_v9  ;;  %v883_v15 = vrot.slane %v882_v12, 2 }
 0x2be   :  { %v872_v38 = vrot.slane %v871_v33, 1  ;;  %v884_v13 = vadd.f32 %v883_v15, %v882_v12 }
 0x2c0   :  { %v873_v32 = vadd.f32 %v872_v38, %v871_v33  ;;  %v885_v34 = vrot.slane %v884_v13, 1 }
 0x2c2   :  { %903 = vmatmul.f32.vlgmr.msra.gmra.mxu0 %v873_v32  ;;  %v886_v39 = vadd.f32 %v885_v34, %v884_v13 }
 0x2c4   :  { %924 = vmatmul.f32.vlgmr.msra.gmra.mxu1 %v886_v39 }
 0x33f   :  { %v904_v46 = vpop.f32.mrf.mxu0 }
 0x340   :  { %v907_v40 = vmul.f32 0.001953125, %v904_v46 }
 0x341   :  { %v925_v41 = vpop.f32.mrf.mxu1 }
 0x342   :  { %v929_v18 = vmul.f32 %v907_v40, %v907_v40  ;;  %v928_v19 = vmul.f32 0.001953125, %v925_v41 }
 0x344   :  { %v930_v42 = vsub.f32 %v928_v19, %v929_v18 }
 0x346   :  { %v931_v24 = vmax.f32 %v930_v42, 0.0 }
 0x348   :  { %v932_v43 = vadd.f32 1e-05, %v931_v24 }
 0x34a   :  { %1324 = vrsqrt.f32 %v932_v43  ;;  %vm939_vm0 = vweird.f32 %v932_v43 }
 0x350   :  { %v1325_v44 = vpop.eup %1324 }
 0x351   :  { %v934_v48 = vmul.f32 %v1325_v44, %v932_v43  ;;  %vm940_vm15 = vweird.f32 %v1325_v44 }
 0x352   :  { %vm941_vm1 = vmor %vm939_vm0, %vm940_vm15 }
 0x353   :  { %v935_v49 = vmul.f32 %v1325_v44, %v934_v48 }
 0x355   :  { %v936_v50 = vmul.f32 0.5, %v935_v49 }
 0x357   :  { %v937_v51 = vsub.f32 1.5, %v936_v50 }
 0x359   :  { %v938_v53 = vmul.f32 %v1325_v44, %v937_v51 }
 0x35b   :  { %v942_v54 = vsel %vm941_vm1, %v1325_v44, %v938_v53 }
 0x35c   :  { %v943_v47 = vmul.f32 %v942_v54, %v863_v52 }
 0x35e   :  { %v944_v45 = vmul.f32 %v943_v47, %v907_v40  ;;  %1260 = vmatmul.msk.f32.vlgmr.msra.gmra.mxu2 %vm517_vm14, %v943_v47 }
 0x360   :  { %v945_v56 = vsub.f32 %v864_v55, %v944_v45 }
 0x362   :  { %1261 = vmatmul.msk.f32.vlgmr.msrb.gmra.mxu0 %vm517_vm14, %v945_v56 }
 0x3df   :  { %v989_v57 = vpop.f32.mrf.mxu0 }
 0x3e0   :  { %v997_v61 = vperm.slane %v989_v57, 0 }
 0x3e1   :  { %v966_v58 = vpop.f32.mrf.mxu2 }
 0x3e2   :  { %v992_v59 = vperm.slane %v966_v58, 0 }
 0x3e4   :  { %v993_v7 = vmul.f32 %v992_v59, %v859_v27  ;;  %v994_v8 = vmul.f32 %v992_v59, %v1761_v26  ;;  %v995_v14 = vmul.f32 %v992_v59, %v861_v62  ;;  %v996_v16 = vmul.f32 %v992_v59, %v862_v1 }
 0x3e6   :  { %v998_v17 = vadd.f32 %v997_v61, %v993_v7  ;;  %v999_v25 = vadd.f32 %v997_v61, %v994_v8  ;;  %v1000_v60 = vadd.f32 %v997_v61, %v995_v14  ;;  %v1001_v28 = vadd.f32 %v997_v61, %v996_v16 }
 0x3e8   :  { %v1002_v29 = vadd.f32 %v998_v17, %v1473_v20  ;;  %v1003_v30 = vadd.f32 %v999_v25, %v1478_v21  ;;  %v1004_v31 = vadd.f32 %v1000_v60, %v1488_v23  ;;  %v1005_v35 = vadd.f32 %v1001_v28, %v1483_v22 }
 0x3ea   :  { %v1006_v26 = vmax.f32 %v1002_v29, 0.0  ;;  %v1007_v27 = vmax.f32 %v1003_v30, 0.0  ;;  %v1008_v62 = vmax.f32 %v1004_v31, 0.0  ;;  %v1009_v36 = vmax.f32 %v1005_v35, 0.0 }
 0x3ec   :  { %1010 = vst [vmem:[#allocation7] sm:$0xff] %v1006_v26 }
 0x3ed   :  { %1011 = vst [vmem:[#allocation7 + $0x8] sm:$0xff] %v1007_v27 }
 0x3ee   :  { %1012 = vst [vmem:[#allocation7 + $0x10] sm:$0xff] %v1008_v62 }
 0x3ef   :  { %1013 = vst [vmem:[#allocation7 + $0x18] sm:$0xff] %v1009_v36 }
 0x3f0   :  { %1026 = dma.vmem_to_hbm [thread:$0]  %s1019_s6, 512, %s1021_s1, [#allocation4], %s1410_s4, %s1410_s4, %s1411_s21  }
 0x3f1   :  { %1402 = dma.done.wait [#allocation4], 512  }
 0x3f2   :  { %1403 = vsyncadd [#allocation4], 4294966784 }
 0x3f3   :  { %1031 = vsyncpa [#allocation3], 1 }
 0x3f4   :  { %1032 = vsyncpa [#allocation6], 1 }
 0x3f5   :  { %1033 = vsyncpa [#allocation4], 1 }

</bundles_post_ra>
